<compile_context>
chip_gen: v5e
topology: v5e:2x2
jax: 0.10.0
libtpu: 0.0.40
codegen_flags: <defaults>
</compile_context>

<pallas_src>
import jax
import jax.numpy as jnp
from jax.experimental import pallas as pl
from jax.experimental.pallas import tpu as pltpu


def _round_up(x: int, m: int) -> int:
    return ((x + m - 1) // m) * m


def _gather_kernel(idx_sm, feat_ref, out_ref):
    # idx_sm   : SMEM (B, npoint_pad) int32   (scalar-prefetched indices)
    # feat_ref : VMEM (1, N, C)               features of batch b in (N, C) layout
    # out_ref  : VMEM (1, TM, C)              gathered-points tile (points-major)
    b = pl.program_id(0)
    t = pl.program_id(1)
    n = feat_ref.shape[1]
    tm = out_ref.shape[1]
    base = t * tm

    def body(i, carry):
        point = idx_sm[b, base + i]
        # Clamp: out-of-range / padded indices read a valid row, never wild VMEM.
        point = jnp.clip(point, 0, n - 1)
        out_ref[0, pl.ds(i, 1), :] = feat_ref[0, pl.ds(point, 1), :]
        return carry

    jax.lax.fori_loop(0, tm, body, 0, unroll=8)


def gather_operation(features: jax.Array, idx: jax.Array) -> jax.Array:
    """features: (B, C, N); idx: (B, npoint) int -> (B, C, npoint)."""
    B, C, N = features.shape
    _, npoint = idx.shape

    # int32 is always enough for point counts; keep features in native dtype
    # (no f32 upcast — the kernel is purely bandwidth-bound).
    idx = idx.astype(jnp.int32)

    # Point-tile size: multiple of 8 (sublane), capped so the double-buffered
    # (TM, C) output tile stays small; pad npoint so the grid divides evenly.
    tm = min(512, _round_up(npoint, 8))
    npoint_pad = _round_up(npoint, tm)
    if npoint_pad != npoint:
        idx = jnp.pad(idx, ((0, 0), (0, npoint_pad - npoint)))

    # (B, C, N) -> (B, N, C): gathered axis on sublanes, channels on lanes.
    feat_t = jnp.transpose(features, (0, 2, 1))

    out_t = pl.pallas_call(
        _gather_kernel,
        out_shape=jax.ShapeDtypeStruct((B, npoint_pad, C), features.dtype),
        grid_spec=pltpu.PrefetchScalarGridSpec(
            num_scalar_prefetch=1,
            grid=(B, npoint_pad // tm),
            in_specs=[
                # Whole (N, C) slab of the current batch; its block index only
                # depends on b, so it is fetched once per batch and reused
                # across all point tiles.
                pl.BlockSpec((1, N, C), lambda b, t, idx_sm: (b, 0, 0)),
            ],
            out_specs=pl.BlockSpec((1, tm, C), lambda b, t, idx_sm: (b, t, 0)),
        ),
        compiler_params=pltpu.CompilerParams(
            dimension_semantics=("parallel", "parallel"),
            # Headroom for the double-buffered per-batch feature slab at
            # realistic pointnet sizes; still below physical VMEM on
            # v5e/v6e/v7x.
            vmem_limit_bytes=48 * 1024 * 1024,
        ),
    )(idx, feat_t)

    # (B, npoint_pad, C) -> (B, C, npoint)
    return jnp.transpose(out_t, (0, 2, 1))[:, :, :npoint]


if __name__ == "__main__":
    key = jax.random.PRNGKey(0)
    kf, ki = jax.random.split(key)

    B, C, N, npoint = 2, 4, 16, 8
    features = jax.random.normal(kf, (B, C, N), dtype=jnp.float32)
    idx = jax.random.randint(ki, (B, npoint), minval=0, maxval=N, dtype=jnp.int32)

    out = gather_operation(features, idx)
    out = jax.block_until_ready(out)

    # reference: out[b, c, m] = features[b, c, idx[b, m]]
    ref = jnp.take_along_axis(features, idx[:, None, :], axis=2)

    assert out.shape == (B, C, npoint), out.shape
    assert out.dtype == features.dtype
    assert jnp.allclose(out, ref), "mismatch vs reference gather"

    print("KERNEL_OK")
</pallas_src>

<mosaic_0001>
module attributes {stable_mosaic.version = 11 : i64} {
  func.func @_gather_kernel(%arg0: i32, %arg1: i32, %arg2: memref<2x8xi32, #tpu.memory_space<smem>>, %arg3: memref<1x16x4xf32, #tpu.memory_space<vmem>>, %arg4: memref<1x8x4xf32, #tpu.memory_space<vmem>>) attributes {dimension_semantics = [#tpu.dimension_semantics<parallel>, #tpu.dimension_semantics<parallel>], iteration_bounds = array<i64: 2, 1>, scalar_prefetch = 1 : i64, scratch_operands = 0 : i64, tpu.core_type = #tpu.core_type<tc>, window_params = [{transform_indices = @transform_0, window_bounds = array<i64: 1, 16, 4>}, {transform_indices = @transform_1, window_bounds = array<i64: 1, 8, 4>}]} {
    %c8_i32 = arith.constant 8 : i32
    %0 = arith.muli %arg1, %c8_i32 : i32
    %c0_i32 = arith.constant 0 : i32
    %1 = arith.addi %0, %c0_i32 : i32
    %2 = arith.index_cast %arg0 : i32 to index
    %3 = arith.index_cast %1 : i32 to index
    %4 = memref.load %arg2[%2, %3] : memref<2x8xi32, #tpu.memory_space<smem>>
    %c0_i32_0 = arith.constant 0 : i32
    %c15_i32 = arith.constant 15 : i32
    %5 = arith.maxsi %c0_i32_0, %4 : i32
    %6 = arith.minsi %c15_i32, %5 : i32
    %c0 = arith.constant 0 : index
    %7 = arith.index_cast %6 : i32 to index
    %c0_1 = arith.constant 0 : index
    %8 = vector.load %arg3[%c0, %7, %c0_1] : memref<1x16x4xf32, #tpu.memory_space<vmem>>, vector<1x1x4xf32>
    %9 = vector.shape_cast %8 : vector<1x1x4xf32> to vector<1x4xf32>
    %c0_2 = arith.constant 0 : index
    %10 = arith.index_cast %c0_i32 : i32 to index
    %c0_3 = arith.constant 0 : index
    %11 = vector.load %arg4[%c0_2, %10, %c0_3] : memref<1x8x4xf32, #tpu.memory_space<vmem>>, vector<1x1x4xf32>
    %12 = vector.shape_cast %11 : vector<1x1x4xf32> to vector<1x4xf32>
    %13 = vector.shape_cast %9 : vector<1x4xf32> to vector<1x1x4xf32>
    tpu.vector_store %arg4[%c0_2, %10, %c0_3], %13 {strides = array<i32>} : memref<1x8x4xf32, #tpu.memory_space<vmem>>, vector<1x1x4xf32>,
    %c1_i32 = arith.constant 1 : i32
    %14 = arith.addi %0, %c1_i32 : i32
    %15 = arith.index_cast %arg0 : i32 to index
    %16 = arith.index_cast %14 : i32 to index
    %17 = memref.load %arg2[%15, %16] : memref<2x8xi32, #tpu.memory_space<smem>>
    %c0_i32_4 = arith.constant 0 : i32
    %c15_i32_5 = arith.constant 15 : i32
    %18 = arith.maxsi %c0_i32_4, %17 : i32
    %19 = arith.minsi %c15_i32_5, %18 : i32
    %c0_6 = arith.constant 0 : index
    %20 = arith.index_cast %19 : i32 to index
    %c0_7 = arith.constant 0 : index
    %21 = vector.load %arg3[%c0_6, %20, %c0_7] : memref<1x16x4xf32, #tpu.memory_space<vmem>>, vector<1x1x4xf32>
    %22 = vector.shape_cast %21 : vector<1x1x4xf32> to vector<1x4xf32>
    %c0_8 = arith.constant 0 : index
    %23 = arith.index_cast %c1_i32 : i32 to index
    %c0_9 = arith.constant 0 : index
    %24 = vector.load %arg4[%c0_8, %23, %c0_9] : memref<1x8x4xf32, #tpu.memory_space<vmem>>, vector<1x1x4xf32>
    %25 = vector.shape_cast %24 : vector<1x1x4xf32> to vector<1x4xf32>
    %26 = vector.shape_cast %22 : vector<1x4xf32> to vector<1x1x4xf32>
    tpu.vector_store %arg4[%c0_8, %23, %c0_9], %26 {strides = array<i32>} : memref<1x8x4xf32, #tpu.memory_space<vmem>>, vector<1x1x4xf32>,
    %c2_i32 = arith.constant 2 : i32
    %27 = arith.addi %0, %c2_i32 : i32
    %28 = arith.index_cast %arg0 : i32 to index
    %29 = arith.index_cast %27 : i32 to index
    %30 = memref.load %arg2[%28, %29] : memref<2x8xi32, #tpu.memory_space<smem>>
    %c0_i32_10 = arith.constant 0 : i32
    %c15_i32_11 = arith.constant 15 : i32
    %31 = arith.maxsi %c0_i32_10, %30 : i32
    %32 = arith.minsi %c15_i32_11, %31 : i32
    %c0_12 = arith.constant 0 : index
    %33 = arith.index_cast %32 : i32 to index
    %c0_13 = arith.constant 0 : index
    %34 = vector.load %arg3[%c0_12, %33, %c0_13] : memref<1x16x4xf32, #tpu.memory_space<vmem>>, vector<1x1x4xf32>
    %35 = vector.shape_cast %34 : vector<1x1x4xf32> to vector<1x4xf32>
    %c0_14 = arith.constant 0 : index
    %36 = arith.index_cast %c2_i32 : i32 to index
    %c0_15 = arith.constant 0 : index
    %37 = vector.load %arg4[%c0_14, %36, %c0_15] : memref<1x8x4xf32, #tpu.memory_space<vmem>>, vector<1x1x4xf32>
    %38 = vector.shape_cast %37 : vector<1x1x4xf32> to vector<1x4xf32>
    %39 = vector.shape_cast %35 : vector<1x4xf32> to vector<1x1x4xf32>
    tpu.vector_store %arg4[%c0_14, %36, %c0_15], %39 {strides = array<i32>} : memref<1x8x4xf32, #tpu.memory_space<vmem>>, vector<1x1x4xf32>,
    %c3_i32 = arith.constant 3 : i32
    %40 = arith.addi %0, %c3_i32 : i32
    %41 = arith.index_cast %arg0 : i32 to index
    %42 = arith.index_cast %40 : i32 to index
    %43 = memref.load %arg2[%41, %42] : memref<2x8xi32, #tpu.memory_space<smem>>
    %c0_i32_16 = arith.constant 0 : i32
    %c15_i32_17 = arith.constant 15 : i32
    %44 = arith.maxsi %c0_i32_16, %43 : i32
    %45 = arith.minsi %c15_i32_17, %44 : i32
    %c0_18 = arith.constant 0 : index
    %46 = arith.index_cast %45 : i32 to index
    %c0_19 = arith.constant 0 : index
    %47 = vector.load %arg3[%c0_18, %46, %c0_19] : memref<1x16x4xf32, #tpu.memory_space<vmem>>, vector<1x1x4xf32>
    %48 = vector.shape_cast %47 : vector<1x1x4xf32> to vector<1x4xf32>
    %c0_20 = arith.constant 0 : index
    %49 = arith.index_cast %c3_i32 : i32 to index
    %c0_21 = arith.constant 0 : index
    %50 = vector.load %arg4[%c0_20, %49, %c0_21] : memref<1x8x4xf32, #tpu.memory_space<vmem>>, vector<1x1x4xf32>
    %51 = vector.shape_cast %50 : vector<1x1x4xf32> to vector<1x4xf32>
    %52 = vector.shape_cast %48 : vector<1x4xf32> to vector<1x1x4xf32>
    tpu.vector_store %arg4[%c0_20, %49, %c0_21], %52 {strides = array<i32>} : memref<1x8x4xf32, #tpu.memory_space<vmem>>, vector<1x1x4xf32>,
    %c4_i32 = arith.constant 4 : i32
    %53 = arith.addi %0, %c4_i32 : i32
    %54 = arith.index_cast %arg0 : i32 to index
    %55 = arith.index_cast %53 : i32 to index
    %56 = memref.load %arg2[%54, %55] : memref<2x8xi32, #tpu.memory_space<smem>>
    %c0_i32_22 = arith.constant 0 : i32
    %c15_i32_23 = arith.constant 15 : i32
    %57 = arith.maxsi %c0_i32_22, %56 : i32
    %58 = arith.minsi %c15_i32_23, %57 : i32
    %c0_24 = arith.constant 0 : index
    %59 = arith.index_cast %58 : i32 to index
    %c0_25 = arith.constant 0 : index
    %60 = vector.load %arg3[%c0_24, %59, %c0_25] : memref<1x16x4xf32, #tpu.memory_space<vmem>>, vector<1x1x4xf32>
    %61 = vector.shape_cast %60 : vector<1x1x4xf32> to vector<1x4xf32>
    %c0_26 = arith.constant 0 : index
    %62 = arith.index_cast %c4_i32 : i32 to index
    %c0_27 = arith.constant 0 : index
    %63 = vector.load %arg4[%c0_26, %62, %c0_27] : memref<1x8x4xf32, #tpu.memory_space<vmem>>, vector<1x1x4xf32>
    %64 = vector.shape_cast %63 : vector<1x1x4xf32> to vector<1x4xf32>
    %65 = vector.shape_cast %61 : vector<1x4xf32> to vector<1x1x4xf32>
    tpu.vector_store %arg4[%c0_26, %62, %c0_27], %65 {strides = array<i32>} : memref<1x8x4xf32, #tpu.memory_space<vmem>>, vector<1x1x4xf32>,
    %c5_i32 = arith.constant 5 : i32
    %66 = arith.addi %0, %c5_i32 : i32
    %67 = arith.index_cast %arg0 : i32 to index
    %68 = arith.index_cast %66 : i32 to index
    %69 = memref.load %arg2[%67, %68] : memref<2x8xi32, #tpu.memory_space<smem>>
    %c0_i32_28 = arith.constant 0 : i32
    %c15_i32_29 = arith.constant 15 : i32
    %70 = arith.maxsi %c0_i32_28, %69 : i32
    %71 = arith.minsi %c15_i32_29, %70 : i32
    %c0_30 = arith.constant 0 : index
    %72 = arith.index_cast %71 : i32 to index
    %c0_31 = arith.constant 0 : index
    %73 = vector.load %arg3[%c0_30, %72, %c0_31] : memref<1x16x4xf32, #tpu.memory_space<vmem>>, vector<1x1x4xf32>
    %74 = vector.shape_cast %73 : vector<1x1x4xf32> to vector<1x4xf32>
    %c0_32 = arith.constant 0 : index
    %75 = arith.index_cast %c5_i32 : i32 to index
    %c0_33 = arith.constant 0 : index
    %76 = vector.load %arg4[%c0_32, %75, %c0_33] : memref<1x8x4xf32, #tpu.memory_space<vmem>>, vector<1x1x4xf32>
    %77 = vector.shape_cast %76 : vector<1x1x4xf32> to vector<1x4xf32>
    %78 = vector.shape_cast %74 : vector<1x4xf32> to vector<1x1x4xf32>
    tpu.vector_store %arg4[%c0_32, %75, %c0_33], %78 {strides = array<i32>} : memref<1x8x4xf32, #tpu.memory_space<vmem>>, vector<1x1x4xf32>,
    %c6_i32 = arith.constant 6 : i32
    %79 = arith.addi %0, %c6_i32 : i32
    %80 = arith.index_cast %arg0 : i32 to index
    %81 = arith.index_cast %79 : i32 to index
    %82 = memref.load %arg2[%80, %81] : memref<2x8xi32, #tpu.memory_space<smem>>
    %c0_i32_34 = arith.constant 0 : i32
    %c15_i32_35 = arith.constant 15 : i32
    %83 = arith.maxsi %c0_i32_34, %82 : i32
    %84 = arith.minsi %c15_i32_35, %83 : i32
    %c0_36 = arith.constant 0 : index
    %85 = arith.index_cast %84 : i32 to index
    %c0_37 = arith.constant 0 : index
    %86 = vector.load %arg3[%c0_36, %85, %c0_37] : memref<1x16x4xf32, #tpu.memory_space<vmem>>, vector<1x1x4xf32>
    %87 = vector.shape_cast %86 : vector<1x1x4xf32> to vector<1x4xf32>
    %c0_38 = arith.constant 0 : index
    %88 = arith.index_cast %c6_i32 : i32 to index
    %c0_39 = arith.constant 0 : index
    %89 = vector.load %arg4[%c0_38, %88, %c0_39] : memref<1x8x4xf32, #tpu.memory_space<vmem>>, vector<1x1x4xf32>
    %90 = vector.shape_cast %89 : vector<1x1x4xf32> to vector<1x4xf32>
    %91 = vector.shape_cast %87 : vector<1x4xf32> to vector<1x1x4xf32>
    tpu.vector_store %arg4[%c0_38, %88, %c0_39], %91 {strides = array<i32>} : memref<1x8x4xf32, #tpu.memory_space<vmem>>, vector<1x1x4xf32>,
    %c7_i32 = arith.constant 7 : i32
    %92 = arith.addi %0, %c7_i32 : i32
    %93 = arith.index_cast %arg0 : i32 to index
    %94 = arith.index_cast %92 : i32 to index
    %95 = memref.load %arg2[%93, %94] : memref<2x8xi32, #tpu.memory_space<smem>>
    %c0_i32_40 = arith.constant 0 : i32
    %c15_i32_41 = arith.constant 15 : i32
    %96 = arith.maxsi %c0_i32_40, %95 : i32
    %97 = arith.minsi %c15_i32_41, %96 : i32
    %c0_42 = arith.constant 0 : index
    %98 = arith.index_cast %97 : i32 to index
    %c0_43 = arith.constant 0 : index
    %99 = vector.load %arg3[%c0_42, %98, %c0_43] : memref<1x16x4xf32, #tpu.memory_space<vmem>>, vector<1x1x4xf32>
    %100 = vector.shape_cast %99 : vector<1x1x4xf32> to vector<1x4xf32>
    %c0_44 = arith.constant 0 : index
    %101 = arith.index_cast %c7_i32 : i32 to index
    %c0_45 = arith.constant 0 : index
    %102 = vector.load %arg4[%c0_44, %101, %c0_45] : memref<1x8x4xf32, #tpu.memory_space<vmem>>, vector<1x1x4xf32>
    %103 = vector.shape_cast %102 : vector<1x1x4xf32> to vector<1x4xf32>
    %104 = vector.shape_cast %100 : vector<1x4xf32> to vector<1x1x4xf32>
    tpu.vector_store %arg4[%c0_44, %101, %c0_45], %104 {strides = array<i32>} : memref<1x8x4xf32, #tpu.memory_space<vmem>>, vector<1x1x4xf32>,
    %c8_i32_46 = arith.constant 8 : i32
    return
  }
  func.func @transform_0(%arg0: i32, %arg1: i32, %arg2: memref<2x8xi32, #tpu.memory_space<smem>>) -> (i32, i32, i32) {
    %c0_i32 = arith.constant 0 : i32
    %c0_i32_0 = arith.constant 0 : i32
    %c0_i32_1 = arith.constant 0 : i32
    return %arg0, %c0_i32, %c0_i32_0 : i32, i32, i32
  }
  func.func @transform_1(%arg0: i32, %arg1: i32, %arg2: memref<2x8xi32, #tpu.memory_space<smem>>) -> (i32, i32, i32) {
    %c0_i32 = arith.constant 0 : i32
    %c0_i32_0 = arith.constant 0 : i32
    return %arg0, %arg1, %c0_i32 : i32, i32, i32
  }
}

</mosaic_0001>

<bundles_post_ra>
// kernel: tpu_custom_call.1
= control target key start
LH: loop header
LB: loop body
LE: loop exit
PB: predicated region body
PF: predicated region fallthrough
CT: control target
= control target key end

     0   :  { %s490_s12 = smov [#allocation3]   ;;  %s580_s0 = inlined_call_operand.vmem [shape: s32[2,8], index: 0, kind: input, shape index: {}]   ;;  %s581_s1 = inlined_call_operand.vmem [shape: f32[2,16,4], index: 1, kind: input, shape index: {}]   ;;  %s582_s2 = inlined_call_operand.vmem [shape: f32[2,8,4], index: 2, kind: output, shape index: {}]  }
   0x1   :  { %s8_s11 = sshll.u32 %s580_s0, 4  ;;  %s9_s11 = int_to_ptr.vmem [resolvable:$true] %s8_s11 }
   0x2   :  { %11 = dma.vmem_to_smem %s9_s11, 32, %s490_s12, [#allocation2] }
   0x3   :  { %476 = dma.done.wait [#allocation2], 32 }
   0x4   :  { %477 = vsyncadd [#allocation2], 4294967264 }
   0x5   :  { %14 = sfence }
   0x6   :  { %s509_s13 = smov 0   ;;  %s511_s14 = smov 0  }
   0x7   :  { %s513_s15 = smov 0  }
   0x8 LB: > { %s32_s0 = sadd.s32 1, %s484_s14  ;;  %p356_p0 = scmp.ge.s32.totalorder %s488_s15, 1  ;;  %s488_s15 = sphi %s513_s15, %s20_s15   ;;  %s484_s14 = sphi %s511_s14, %s584_s14   ;;  %s480_s13 = sphi %s509_s13, %s583_s13  }
   0x9   : > { %p34_p1 = scmp.ge.s32.totalorder %s32_s0, 2  ;;  %p110_p2 = scmp.lt.s32.totalorder %s488_s15, 3 }
   0xb   : > { %s586_s0 = smov (%p34_p1, %s32_s0), 0  ;;  %p111_p3 = pnand %p356_p0, %p110_p2 }
   0xc   : > { %p132_p4 = scmp.lt.s32.totalorder (!%p111_p3), %s480_s13, 1  ;;  %s527_s16 = sshll.u32 (!%p111_p3), %s480_s13, 7 }
   0xd   : > { %114 = sbr.rel (%p111_p3) target bundleno = 48 (0x30), region = 24  ;;  %s152_s17 = sld [smem:[#allocation3 + %s527_s16]] (!%p111_p3) }
   0xe   : > { %s168_s18 = sadd.s32 (!%p111_p3), 1, %s527_s16  ;;  %s184_s20 = sadd.s32 (!%p111_p3), 2, %s527_s16 }
   0xf   : > { %s169_s19 = sld [smem:[#allocation3 + %s168_s18]] (!%p111_p3)  ;;  %s200_s30 = sadd.s32 (!%p111_p3), 3, %s527_s16 }
  0x10   : > { %s185_s29 = sld [smem:[#allocation3 + %s184_s20]] (!%p111_p3)  ;;  %s216_s4 = sadd.s32 (!%p111_p3), 4, %s527_s16 }
  0x11   : > { %s201_s3 = sld [smem:[#allocation3 + %s200_s30]] (!%p111_p3)  ;;  %s232_s10 = sadd.s32 (!%p111_p3), 5, %s527_s16 }
  0x12   : > { %s588_s13 = smov (!%p132_p4, %s480_s13), 1  ;;  %vm159_vm0 = vcmask 24576   ;;  %s217_s9 = sld [smem:[#allocation3 + %s216_s4]] }
  0x13   : > { %s410_s21 = sshll.u32 %s588_s13, 4  ;;  %s359_s22 = sshll.u32 %s588_s13, 3 }
  0x14   : > { %s535_s25 = scalar_lea.vmem %s581_s1, %s410_s21  ;;  %s540_s28 = scalar_lea.vmem %s582_s2, %s359_s22 }
  0x15   : > { %p153_p5 = scmp.gt.s32.totalorder %s152_s17, 0  ;;  %p361_p6 = scmp.lt.s32.totalorder %s152_s17, 15 }
  0x16   : > { %p170_p7 = scmp.gt.s32.totalorder %s169_s19, 0  ;;  %p367_p8 = scmp.lt.s32.totalorder %s169_s19, 15 }
  0x17   : > { %s590_s17 = smov (!%p153_p5, %s152_s17), 0  ;;  %p186_p9 = scmp.gt.s32.totalorder %s185_s29, 0 }
  0x18   : > { %s592_s17 = smov (!%p361_p6, %s590_s17), 15  ;;  %s594_s19 = smov (!%p170_p7, %s169_s19), 0 }
  0x19   : > { %s157_s5 = scalar_lea.vmem %s535_s25, %s592_s17  ;;  %s596_s19 = smov (!%p367_p8, %s594_s19), 15 }
  0x1a   : > { %v158_v0 = vld [vmem:[%s157_s5] sm:$0x1]  ;;  %s187_s6 = scalar_select %p186_p9, %s185_s29, 0 }
  0x1b   : > { %160 = vst.msk [vmem:[%s540_s28] sm:$0x1] %vm159_vm0, %v158_v0  ;;  %s174_s7 = scalar_lea.vmem %s535_s25, %s596_s19  ;;  %p373_p10 = scmp.lt.s32.totalorder %s185_s29, 15 }
  0x1c   : > { %v175_v1 = vld [vmem:[%s174_s7] sm:$0x1]  ;;  %p202_p11 = scmp.gt.s32.totalorder %s201_s3, 0  ;;  %p379_p12 = scmp.lt.s32.totalorder %s201_s3, 15 }
  0x1d   : > { %176 = vst.msk [vmem:[%s540_s28 + $0x1] sm:$0x1] %vm159_vm0, %v175_v1  ;;  %s598_s6 = smov (!%p373_p10, %s187_s6), 15  ;;  %s248_s11 = sadd.s32 6, %s527_s16 }
  0x1e   : > { %s600_s3 = smov (!%p202_p11, %s201_s3), 0  ;;  %s190_s8 = scalar_lea.vmem %s535_s25, %s598_s6 }
  0x1f   : > { %v191_v2 = vld [vmem:[%s190_s8] sm:$0x1]  ;;  %s602_s3 = smov (!%p379_p12, %s600_s3), 15  ;;  %s233_s13 = sld [smem:[#allocation3 + %s232_s10]] }
  0x20   : > { %192 = vst.msk [vmem:[%s540_s28 + $0x2] sm:$0x1] %vm159_vm0, %v191_v2  ;;  %s206_s12 = scalar_lea.vmem %s535_s25, %s602_s3  ;;  %s249_s17 = sld [smem:[#allocation3 + %s248_s11]] }
  0x21   : > { %v207_v3 = vld [vmem:[%s206_s12] sm:$0x1]  ;;  %s264_s18 = sadd.s32 7, %s527_s16  ;;  %p218_p13 = scmp.gt.s32.totalorder %s217_s9, 0 }
  0x22   : > { %208 = vst.msk [vmem:[%s540_s28 + $0x3] sm:$0x1] %vm159_vm0, %v207_v3  ;;  %p385_p0 = scmp.lt.s32.totalorder %s217_s9, 15  ;;  %s265_s19 = sld [smem:[#allocation3 + %s264_s18]] }
  0x23   : > { %s604_s9 = smov (!%p218_p13, %s217_s9), 0 }
  0x24   : > { %s606_s9 = smov (!%p385_p0, %s604_s9), 15 }
  0x25   : > { %p234_p1 = scmp.gt.s32.totalorder %s233_s13, 0  ;;  %p391_p2 = scmp.lt.s32.totalorder %s233_s13, 15 }
  0x26   : > { %s222_s20 = scalar_lea.vmem %s535_s25, %s606_s9  ;;  %p250_p3 = scmp.gt.s32.totalorder %s249_s17, 0 }
  0x27   : > { %s608_s13 = smov (!%p234_p1, %s233_s13), 0  ;;  %v223_v4 = vld [vmem:[%s222_s20] sm:$0x1]  ;;  %p397_p4 = scmp.lt.s32.totalorder %s249_s17, 15 }
  0x28   : > { %s610_s13 = smov (!%p391_p2, %s608_s13), 15  ;;  %224 = vst.msk [vmem:[%s540_s28 + $0x4] sm:$0x1] %vm159_vm0, %v223_v4  ;;  %p266_p5 = scmp.gt.s32.totalorder %s265_s19, 0 }
  0x29   : > { %s251_s16 = scalar_select %p250_p3, %s249_s17, 0 }
  0x2a   : > { %s238_s21 = scalar_lea.vmem %s535_s25, %s610_s13  ;;  %p403_p6 = scmp.lt.s32.totalorder %s265_s19, 15 }
  0x2b   : > { %v239_v5 = vld [vmem:[%s238_s21] sm:$0x1]  ;;  %s612_s16 = smov (!%p397_p4, %s251_s16), 15  ;;  %s614_s19 = smov (!%p266_p5, %s265_s19), 0 }
  0x2c   : > { %240 = vst.msk [vmem:[%s540_s28 + $0x5] sm:$0x1] %vm159_vm0, %v239_v5  ;;  %s254_s22 = scalar_lea.vmem %s535_s25, %s612_s16  ;;  %s616_s19 = smov (!%p403_p6, %s614_s19), 15 }
  0x2d   : > { %v255_v6 = vld [vmem:[%s254_s22] sm:$0x1]  ;;  %s270_s23 = scalar_lea.vmem %s535_s25, %s616_s19 }
  0x2e   : > { %256 = vst.msk [vmem:[%s540_s28 + $0x6] sm:$0x1] %vm159_vm0, %v255_v6  ;;  %v271_v7 = vld [vmem:[%s270_s23] sm:$0x1] }
  0x2f   : > { %272 = vst.msk [vmem:[%s540_s28 + $0x7] sm:$0x1] %vm159_vm0, %v271_v7 }
  0x30 PF: > { %s20_s15 = sadd.s32 1, %s488_s15   ;;  %s583_s13 = smov %s484_s14 }
  0x31   : > { %p17_p7 = scmp.ge.s32.totalorder %s20_s15, 4   ;;  %s584_s14 = smov %s586_s0 }
  0x33   :  { %19 = sbr.rel (!%p17_p7) target bundleno = 8 (0x8), region = 62 }

</bundles_post_ra>
